<compile_context>
chip_gen: v6e
topology: v6e:2x2x1
jax: 0.10.0
libtpu: 0.0.40
codegen_flags: <defaults>
</compile_context>

<pallas_src>
import jax
import jax.numpy as jnp
from jax.experimental import pallas as pl
from jax.experimental.pallas import tpu as pltpu


def _global_max_pool1d_kernel(x_ref, o_ref):
    # x_ref: (Bt, C, Lt) tile in VMEM ; o_ref: (Bt, Lt)
    # Reduction over axis 1 (channels). Per-column reduction, so ragged-edge
    # padding along B / L never bleeds into valid output elements.
    o_ref[...] = jnp.max(x_ref[...], axis=1)


def _choose_tiles(B, C, L, itemsize):
    """Pick (Bt, Lt) tiles: lane-dense, (8,128)-aligned, ~<=8 MiB per input buffer."""
    budget = 8 * 1024 * 1024  # bytes per (single) input buffer; double-buffered by Pallas

    # Lane (last) dim: full if small, else a 512-wide 128-multiple tile.
    Lt = L if L <= 512 else 512
    # Batch tile: full B if modest, else 64 (multiple of 8).
    Bt = B if B <= 64 else 64

    # Shrink to fit the VMEM budget: batch first (keeps lanes dense), then lanes.
    while Bt * C * Lt * itemsize > budget and Bt > 8:
        Bt = max(8, Bt // 2)
    while Bt * C * Lt * itemsize > budget and Lt > 128:
        Lt = max(128, Lt // 2)
    # NOTE: if C alone is so large that (8, C, 128) still overflows VMEM, the C
    # axis would need to become an "arbitrary" grid axis with a -inf-initialized
    # VMEM accumulator (P3 pattern).
    # TODO(synk): add C-axis accumulator tiling for extremely large channel counts.
    return Bt, Lt


def global_max_pool1d(x):
    """Pallas equivalent of `torch.max(x, 1)[0]` for a 3-D NCL tensor."""
    B, C, L = x.shape
    itemsize = jnp.dtype(x.dtype).itemsize
    Bt, Lt = _choose_tiles(B, C, L, itemsize)

    grid = (pl.cdiv(B, Bt), pl.cdiv(L, Lt))

    cost = pl.CostEstimate(
        flops=B * C * L,
        bytes_accessed=(B * C * L + B * L) * itemsize,
        transcendentals=0,
    )

    return pl.pallas_call(
        _global_max_pool1d_kernel,
        out_shape=jax.ShapeDtypeStruct((B, L), x.dtype),
        grid_spec=pl.GridSpec(
            grid=grid,
            # Keep C whole inside every block; tile over batch and length.
            in_specs=[pl.BlockSpec((Bt, C, Lt), lambda i, j: (i, 0, j))],
            out_specs=pl.BlockSpec((Bt, Lt), lambda i, j: (i, j)),
        ),
        compiler_params=pltpu.CompilerParams(
            dimension_semantics=("parallel", "parallel"),
            vmem_limit_bytes=48 * 1024 * 1024,
        ),
        cost_estimate=cost,
    )(x)


if __name__ == "__main__":
    key = jax.random.PRNGKey(0)

    # Primary small NCL input: batch=2, channels=4, length=16 (single full block).
    x = jax.random.normal(key, (2, 4, 16), dtype=jnp.float32)
    out = jax.block_until_ready(global_max_pool1d(x))
    ref = jnp.max(x, axis=1)
    assert out.shape == (2, 16)
    assert jnp.allclose(out, ref), "mismatch vs reference (small shape)"

    # Secondary shape that exercises the tiled path (L > 512 -> 2 L-tiles, ragged edge).
    key2 = jax.random.PRNGKey(1)
    x2 = jax.random.normal(key2, (4, 3, 640), dtype=jnp.float32)
    out2 = jax.block_until_ready(global_max_pool1d(x2))
    ref2 = jnp.max(x2, axis=1)
    assert out2.shape == (4, 640)
    assert jnp.allclose(out2, ref2), "mismatch vs reference (tiled shape)"

    print("KERNEL_OK")
</pallas_src>

<mosaic_0001>
module attributes {stable_mosaic.version = 11 : i64} {
  func.func @_global_max_pool1d_kernel(%arg0: i32, %arg1: i32, %arg2: memref<2x4x16xf32, #tpu.memory_space<vmem>>, %arg3: memref<2x16xf32, #tpu.memory_space<vmem>>) attributes {dimension_semantics = [#tpu.dimension_semantics<parallel>, #tpu.dimension_semantics<parallel>], iteration_bounds = array<i64: 1, 1>, scalar_prefetch = 0 : i64, scratch_operands = 0 : i64, tpu.core_type = #tpu.core_type<tc>, window_params = [{transform_indices = @transform_0, window_bounds = array<i64: 2, 4, 16>}, {transform_indices = @transform_1, window_bounds = array<i64: 2, 16>}]} {
    %c0 = arith.constant 0 : index
    %c0_0 = arith.constant 0 : index
    %c0_1 = arith.constant 0 : index
    %0 = vector.load %arg2[%c0, %c0_0, %c0_1] : memref<2x4x16xf32, #tpu.memory_space<vmem>>, vector<2x4x16xf32>
    %cst = arith.constant dense<0xFF800000> : vector<2x16xf32>
    %1 = vector.multi_reduction <maximumf>, %0, %cst [1] : vector<2x4x16xf32> to vector<2x16xf32>
    %c0_2 = arith.constant 0 : index
    %c0_3 = arith.constant 0 : index
    %2 = vector.load %arg3[%c0_2, %c0_3] : memref<2x16xf32, #tpu.memory_space<vmem>>, vector<2x16xf32>
    tpu.vector_store %arg3[%c0_2, %c0_3], %1 {strides = array<i32>} : memref<2x16xf32, #tpu.memory_space<vmem>>, vector<2x16xf32>,
    return
  }
  func.func @transform_0(%arg0: i32, %arg1: i32) -> (i32, i32, i32) {
    %c0_i32 = arith.constant 0 : i32
    %c0_i32_0 = arith.constant 0 : i32
    return %arg0, %c0_i32, %arg1 : i32, i32, i32
  }
  func.func @transform_1(%arg0: i32, %arg1: i32) -> (i32, i32) {
    %c0_i32 = arith.constant 0 : i32
    return %arg0, %arg1 : i32, i32
  }
}

</mosaic_0001>

<bundles_post_ra>
// kernel: tpu_custom_call.1
= control target key start
LH: loop header
LB: loop body
LE: loop exit
PB: predicated region body
PF: predicated region fallthrough
CT: control target
= control target key end

     0   :  { %6 = vsyncpa [#allocation3], 0  ;;  %s130_s0 = inlined_call_operand.hbm [shape: f32[2,4,16], index: 0, kind: input, shape index: {}]   ;;  %s131_s1 = inlined_call_operand.hbm [shape: f32[2,16], index: 1, kind: output, shape index: {}]  }
   0x1   :  { %7 = vsyncpa [#allocation4], 0  ;;  %s110_s6 = smov [#allocation2]  }
   0x2   :  { %s13_s7 = sshll.u32 %s110_s6, 4  ;;  %s14_s7 = int_to_ptr.vmem [resolvable:$true] %s13_s7 }
   0x3   :  { %s74_s8 = scalar_lea.vmem %s14_s7, 128  ;;  %p79_p1 = scmp.lt.s32.totalorder %s14_s7, %s14_s7 }
   0x4   :  { %p75_p0 = scmp.ne.s32.totalorder %s14_s7, %s74_s8  ;;  %p80_p2 = scmp.lt.s32.totalorder %s74_s8, %s74_s8 }
   0x6   :  { %p81_p3 = por %p80_p2, %p79_p1 }
   0x8   :  { %p82_p4 = pnand %p81_p3, %p75_p0 }
   0xa   :  { %85 = shalt.err (!%p82_p4)
}
   0xb   :  { %s111_s9 = smov 64   ;;  %s112_s10 = smov 4  }
   0xc   :  { %19 = dma.hbm_to_vmem [thread:$0]  %s130_s0, 128, %s14_s7, [#allocation3], %s111_s9, %s111_s9, %s112_s10  }
   0xd   :  { %106 = dma.done.wait [#allocation3], 128  }
   0xe   :  { %107 = vsyncadd [#allocation3], 4294967168  ;;  %vm25_vm0 = vcmask 125952   ;;  %v23_v0 = vld [vmem:[#allocation2] sm:$0xf]  ;;  %s113_s13 = smov [#allocation5]  }
   0xf   :  { %v24_v1 = vld [vmem:[#allocation2 + $0x4] sm:$0xf]  ;;  %v26_v2 = vsel %vm25_vm0, %v23_v0, -inf  ;;  %s53_s14 = sshll.u32 %s113_s13, 4  ;;  %vm42_vm1 = vcmask 1041409   ;;  %vm45_vm2 = vcmask 123904   ;;  %s54_s14 = int_to_ptr.vmem [resolvable:$true] %s53_s14 }
  0x10   :  { %v33_v3 = vsel %vm25_vm0, %v24_v1, -inf  ;;  %v27_v4 = vrot.slane %v26_v2, 4  ;;  %s86_s0 = scalar_lea.vmem %s54_s14, 32  ;;  %p91_p6 = scmp.lt.s32.totalorder %s54_s14, %s54_s14 }
  0x11   :  { %v34_v5 = vrot.slane %v33_v3, 4  ;;  %p87_p5 = scmp.ne.s32.totalorder %s54_s14, %s86_s0  ;;  %p92_p7 = scmp.lt.s32.totalorder %s86_s0, %s86_s0 }
  0x12   :  { %v28_v6 = vmax.f32 %v26_v2, %v27_v4 }
  0x13   :  { %v35_v7 = vmax.f32 %v33_v3, %v34_v5  ;;  %p93_p8 = por %p92_p7, %p91_p6 }
  0x14   :  { %v29_v8 = vrot.slane %v28_v6, 2 }
  0x15   :  { %v36_v9 = vrot.slane %v35_v7, 2  ;;  %p94_p9 = pnand %p93_p8, %p87_p5 }
  0x16   :  { %v30_v10 = vmax.f32 %v28_v6, %v29_v8 }
  0x17   :  { %v37_v11 = vmax.f32 %v35_v7, %v36_v9 }
  0x18   :  { %v31_v12 = vrot.slane %v30_v10, 1 }
  0x19   :  { %v38_v13 = vrot.slane %v37_v11, 1 }
  0x1a   :  { %v32_v14 = vmax.f32 %v30_v10, %v31_v12 }
  0x1b   :  { %v39_v15 = vmax.f32 %v37_v11, %v38_v13 }
  0x1d   :  { %v43_v16 = vsel %vm42_vm1, %v39_v15, %v32_v14 }
  0x1e   :  { %46 = vst.msk [vmem:[#allocation5] sm:$0x3] %vm45_vm2, %v43_v16 }
  0x1f   :  { %97 = shalt.err (!%p94_p9)
}
  0x20   :  { %56 = dma.vmem_to_hbm [thread:$0]  %s54_s14, 32, %s131_s1, [#allocation4]  }
  0x21   :  { %108 = dma.done.wait [#allocation4], 32  }
  0x22   :  { %109 = vsyncadd [#allocation4], 4294967264 }
  0x23   :  { %60 = vsyncpa [#allocation3], 1 }
  0x24   :  { %61 = vsyncpa [#allocation4], 1 }

</bundles_post_ra>
